<compile_context>
chip_gen: v5e
topology: v5e:2x2
jax: 0.10.0
libtpu: 0.0.40
codegen_flags: <defaults>
</compile_context>

<pallas_src>
import jax
import jax.numpy as jnp
from jax.experimental import pallas as pl
from jax.experimental.pallas import tpu as pltpu

LANE = 128  # TPU lane width; hidden / output feature dims padded to this


def _round_up(n, m):
    return ((n + m - 1) // m) * m


def fcn_kernel(x_ref, w1_ref, b1_ref, w2_ref, b2_ref, w3_ref, b3_ref, o_ref):
    # Layer 1: Linear + ReLU.  x arrives as f32; cast to bf16 in-register,
    # MXU accumulates in f32.
    x = x_ref[...].astype(w1_ref.dtype)
    h = jnp.dot(x, w1_ref[...], preferred_element_type=jnp.float32)
    h = jnp.maximum(h + b1_ref[...], 0.0)
    # Layer 2: Linear + ReLU
    h = jnp.dot(h.astype(w2_ref.dtype), w2_ref[...],
                preferred_element_type=jnp.float32)
    h = jnp.maximum(h + b2_ref[...], 0.0)
    # Layer 3: Linear + Sigmoid; lane-dense 128-wide bf16 store (extra cols
    # are zero-weight garbage and get sliced off by the wrapper).
    h = jnp.dot(h.astype(w3_ref.dtype), w3_ref[...],
                preferred_element_type=jnp.float32)
    o_ref[...] = jax.nn.sigmoid(h + b3_ref[...]).astype(o_ref.dtype)


def init_params(key, input_dim, hidden_dim, output_dim):
    """PyTorch nn.Linear default init U[-1/sqrt(fan_in), 1/sqrt(fan_in)].
    Weights are stored pre-transposed as (in_features, out_features)."""
    hidden2 = round(hidden_dim // 2)  # matches the PyTorch module definition
    dims = [(input_dim, hidden_dim), (hidden_dim, hidden2), (hidden2, output_dim)]
    params = {}
    keys = jax.random.split(key, 6)
    for i, (fan_in, fan_out) in enumerate(dims, start=1):
        bound = 1.0 / (fan_in ** 0.5)
        params[f"w{i}"] = jax.random.uniform(
            keys[2 * (i - 1)], (fan_in, fan_out), jnp.float32, -bound, bound)
        params[f"b{i}"] = jax.random.uniform(
            keys[2 * (i - 1) + 1], (fan_out,), jnp.float32, -bound, bound)
    return params


def prepare_params(params, compute_dtype=jnp.bfloat16):
    """One-time: zero-pad feature dims up to a multiple of 128 and cast weights
    to bf16.  Layer 1's K (input) dim is left UNPADDED so x can be streamed
    from HBM as-is.  Zero padding keeps the math exact: padded hidden columns
    stay exactly 0 through ReLU, and padded output columns are sliced off
    outside the kernel."""
    out = {}
    for i in (1, 2, 3):
        w = params[f"w{i}"]
        b = params[f"b{i}"]
        fi, fo = w.shape
        fi_p = fi if i == 1 else _round_up(fi, LANE)   # layer-1 K stays unpadded
        fo_p = _round_up(fo, LANE)
        w_p = jnp.zeros((fi_p, fo_p), jnp.float32).at[:fi, :fo].set(w)
        b_p = jnp.zeros((1, fo_p), jnp.float32).at[:, :fo].set(b.reshape(1, -1))
        out[f"w{i}"] = w_p.astype(compute_dtype)
        out[f"b{i}"] = b_p                             # biases stay f32 (added post-MXU)
    out["input_dim"] = int(params["w1"].shape[0])
    out["output_dim"] = int(params["w3"].shape[1])
    return out


def fcn_classifier(x, pp, *, block_b=1024):
    """x: (B, input_dim) f32.  pp: output of prepare_params().  Returns (B, output_dim) f32."""
    B, d_in = x.shape
    assert d_in == pp["input_dim"]
    w1, b1 = pp["w1"], pp["b1"]
    w2, b2 = pp["w2"], pp["b2"]
    w3, b3 = pp["w3"], pp["b3"]
    h1_p = w1.shape[1]
    h2_p = w2.shape[1]
    d_out_p = w3.shape[1]
    d_out = pp["output_dim"]

    # Batch tile selection (no batch padding of x; ragged last tile is masked):
    #  * large B: fixed block_b-row tiles (multiple of 16 for bf16 packing).
    #  * B fits in one tile but >= 64: split in two so v7x's 2nd TC has work.
    #  * tiny B: single full-dim block (always a legal block shape).
    block_b = _round_up(block_b, 16)
    if B > block_b:
        tb = block_b
    elif B >= 64:
        tb = _round_up(pl.cdiv(B, 2), 16)
    else:
        tb = B
    grid = (pl.cdiv(B, tb),)

    flops = 2 * B * (d_in * h1_p + h1_p * h2_p + h2_p * d_out_p)
    bytes_accessed = (
        int(x.size) * x.dtype.itemsize
        + sum(int(a.size) * a.dtype.itemsize for a in (w1, b1, w2, b2, w3, b3))
        + B * d_out_p * 2)  # bf16 output writeback
    cost = pl.CostEstimate(flops=flops,
                           transcendentals=B * d_out_p,
                           bytes_accessed=bytes_accessed)

    out_p = pl.pallas_call(
        fcn_kernel,
        out_shape=jax.ShapeDtypeStruct((B, d_out_p), jnp.bfloat16),
        grid=grid,
        in_specs=[
            pl.BlockSpec((tb, d_in), lambda i: (i, 0)),      # x: f32, unpadded, pipelined
            pl.BlockSpec((d_in, h1_p), lambda i: (0, 0)),    # weights/biases: VMEM-resident
            pl.BlockSpec((1, h1_p), lambda i: (0, 0)),
            pl.BlockSpec((h1_p, h2_p), lambda i: (0, 0)),
            pl.BlockSpec((1, h2_p), lambda i: (0, 0)),
            pl.BlockSpec((h2_p, d_out_p), lambda i: (0, 0)),
            pl.BlockSpec((1, d_out_p), lambda i: (0, 0)),
        ],
        out_specs=pl.BlockSpec((tb, d_out_p), lambda i: (i, 0)),
        compiler_params=pltpu.CompilerParams(
            dimension_semantics=("parallel",),        # 2-TC sharding on v7x
            vmem_limit_bytes=32 * 1024 * 1024),        # ample for tb<=2048 on all gens
        cost_estimate=cost,
    )(x, w1, b1, w2, b2, w3, b3)

    # Strip output-lane padding; cast back to f32 to match the PyTorch forward.
    return out_p[:, :d_out].astype(jnp.float32)


if __name__ == "__main__":
    input_dim, hidden_dim, output_dim = 16, 32, 4
    batch = 8

    key = jax.random.PRNGKey(0)
    k_params, k_x = jax.random.split(key)
    params = init_params(k_params, input_dim, hidden_dim, output_dim)
    padded = prepare_params(params)
    x = jax.random.normal(k_x, (batch, input_dim), jnp.float32)

    out = fcn_classifier(x, padded)
    out = jax.block_until_ready(out)

    # Reference in plain f32 JAX (same math as the PyTorch forward).
    h = jnp.maximum(x @ params["w1"] + params["b1"], 0.0)
    h = jnp.maximum(h @ params["w2"] + params["b2"], 0.0)
    ref = jax.nn.sigmoid(h @ params["w3"] + params["b3"])

    assert out.shape == (batch, output_dim)
    # bf16 MXU inputs + bf16 output store with f32 accumulation -> relaxed
    # tolerance vs the f32 reference.
    assert jnp.allclose(out, ref, atol=2e-2, rtol=2e-2), (
        f"max abs err {jnp.max(jnp.abs(out - ref))}")

    print("KERNEL_OK")
</pallas_src>

<mosaic_0001>
module attributes {stable_mosaic.version = 11 : i64} {
  func.func @fcn_kernel(%arg0: i32, %arg1: memref<8x16xf32, #tpu.memory_space<vmem>>, %arg2: memref<16x128xbf16, #tpu.memory_space<vmem>>, %arg3: memref<1x128xf32, #tpu.memory_space<vmem>>, %arg4: memref<128x128xbf16, #tpu.memory_space<vmem>>, %arg5: memref<1x128xf32, #tpu.memory_space<vmem>>, %arg6: memref<128x128xbf16, #tpu.memory_space<vmem>>, %arg7: memref<1x128xf32, #tpu.memory_space<vmem>>, %arg8: memref<8x128xbf16, #tpu.memory_space<vmem>>) attributes {dimension_semantics = [#tpu.dimension_semantics<parallel>], iteration_bounds = array<i64: 1>, scalar_prefetch = 0 : i64, scratch_operands = 0 : i64, tpu.core_type = #tpu.core_type<tc>, window_params = [{transform_indices = @transform_0, window_bounds = array<i64: 8, 16>}, {pipeline_mode = #tpu.pipeline_mode<synchronous>, transform_indices = @transform_1, window_bounds = array<i64: 16, 128>}, {pipeline_mode = #tpu.pipeline_mode<synchronous>, transform_indices = @transform_2, window_bounds = array<i64: 1, 128>}, {pipeline_mode = #tpu.pipeline_mode<synchronous>, transform_indices = @transform_3, window_bounds = array<i64: 128, 128>}, {pipeline_mode = #tpu.pipeline_mode<synchronous>, transform_indices = @transform_4, window_bounds = array<i64: 1, 128>}, {pipeline_mode = #tpu.pipeline_mode<synchronous>, transform_indices = @transform_5, window_bounds = array<i64: 128, 128>}, {pipeline_mode = #tpu.pipeline_mode<synchronous>, transform_indices = @transform_6, window_bounds = array<i64: 1, 128>}, {transform_indices = @transform_7, window_bounds = array<i64: 8, 128>}]} {
    %c0 = arith.constant 0 : index
    %c0_0 = arith.constant 0 : index
    %0 = vector.load %arg1[%c0, %c0_0] : memref<8x16xf32, #tpu.memory_space<vmem>>, vector<8x16xf32>
    %1 = arith.truncf %0 : vector<8x16xf32> to vector<8x16xbf16>
    %c0_1 = arith.constant 0 : index
    %c0_2 = arith.constant 0 : index
    %2 = vector.load %arg2[%c0_1, %c0_2] : memref<16x128xbf16, #tpu.memory_space<vmem>>, vector<16x128xbf16>
    %cst = arith.constant dense<0.000000e+00> : vector<8x128xf32>
    %3 = tpu.matmul %1, %2, %cst {dimension_numbers = #tpu.dot_dimension_numbers<[1], [0], [0], [1], [0, 0, 1, 1], [], []>} : vector<8x16xbf16>, vector<16x128xbf16>, vector<8x128xf32> -> vector<8x128xf32>
    %c0_3 = arith.constant 0 : index
    %c0_4 = arith.constant 0 : index
    %4 = vector.load %arg3[%c0_3, %c0_4] : memref<1x128xf32, #tpu.memory_space<vmem>>, vector<1x128xf32>
    %5 = vector.broadcast %4 : vector<1x128xf32> to vector<8x128xf32>
    %6 = arith.addf %3, %5 : vector<8x128xf32>
    %cst_5 = arith.constant 0.000000e+00 : f32
    %7 = vector.broadcast %cst_5 : f32 to vector<8x128xf32>
    %8 = arith.maximumf %6, %7 : vector<8x128xf32>
    %9 = arith.truncf %8 : vector<8x128xf32> to vector<8x128xbf16>
    %c0_6 = arith.constant 0 : index
    %c0_7 = arith.constant 0 : index
    %10 = vector.load %arg4[%c0_6, %c0_7] : memref<128x128xbf16, #tpu.memory_space<vmem>>, vector<128x128xbf16>
    %cst_8 = arith.constant dense<0.000000e+00> : vector<8x128xf32>
    %11 = tpu.matmul %9, %10, %cst_8 {dimension_numbers = #tpu.dot_dimension_numbers<[1], [0], [0], [1], [0, 0, 1, 1], [], []>} : vector<8x128xbf16>, vector<128x128xbf16>, vector<8x128xf32> -> vector<8x128xf32>
    %c0_9 = arith.constant 0 : index
    %c0_10 = arith.constant 0 : index
    %12 = vector.load %arg5[%c0_9, %c0_10] : memref<1x128xf32, #tpu.memory_space<vmem>>, vector<1x128xf32>
    %13 = vector.broadcast %12 : vector<1x128xf32> to vector<8x128xf32>
    %14 = arith.addf %11, %13 : vector<8x128xf32>
    %cst_11 = arith.constant 0.000000e+00 : f32
    %15 = vector.broadcast %cst_11 : f32 to vector<8x128xf32>
    %16 = arith.maximumf %14, %15 : vector<8x128xf32>
    %17 = arith.truncf %16 : vector<8x128xf32> to vector<8x128xbf16>
    %c0_12 = arith.constant 0 : index
    %c0_13 = arith.constant 0 : index
    %18 = vector.load %arg6[%c0_12, %c0_13] : memref<128x128xbf16, #tpu.memory_space<vmem>>, vector<128x128xbf16>
    %cst_14 = arith.constant dense<0.000000e+00> : vector<8x128xf32>
    %19 = tpu.matmul %17, %18, %cst_14 {dimension_numbers = #tpu.dot_dimension_numbers<[1], [0], [0], [1], [0, 0, 1, 1], [], []>} : vector<8x128xbf16>, vector<128x128xbf16>, vector<8x128xf32> -> vector<8x128xf32>
    %c0_15 = arith.constant 0 : index
    %c0_16 = arith.constant 0 : index
    %20 = vector.load %arg7[%c0_15, %c0_16] : memref<1x128xf32, #tpu.memory_space<vmem>>, vector<1x128xf32>
    %21 = vector.broadcast %20 : vector<1x128xf32> to vector<8x128xf32>
    %22 = arith.addf %19, %21 : vector<8x128xf32>
    %23 = arith.negf %22 : vector<8x128xf32>
    %24 = math.exp %23 : vector<8x128xf32>
    %cst_17 = arith.constant 1.000000e+00 : f32
    %25 = vector.broadcast %cst_17 : f32 to vector<8x128xf32>
    %26 = arith.addf %25, %24 : vector<8x128xf32>
    %27 = arith.divf %25, %26 : vector<8x128xf32>
    %28 = arith.truncf %27 : vector<8x128xf32> to vector<8x128xbf16>
    %c0_18 = arith.constant 0 : index
    %c0_19 = arith.constant 0 : index
    %29 = vector.load %arg8[%c0_18, %c0_19] : memref<8x128xbf16, #tpu.memory_space<vmem>>, vector<8x128xbf16>
    tpu.vector_store %arg8[%c0_18, %c0_19], %28 {strides = array<i32>} : memref<8x128xbf16, #tpu.memory_space<vmem>>, vector<8x128xbf16>,
    return
  }
  func.func @transform_0(%arg0: i32) -> (i32, i32) {
    %c0_i32 = arith.constant 0 : i32
    %c0_i32_0 = arith.constant 0 : i32
    return %arg0, %c0_i32 : i32, i32
  }
  func.func @transform_1(%arg0: i32) -> (i32, i32) {
    %c0_i32 = arith.constant 0 : i32
    %c0_i32_0 = arith.constant 0 : i32
    %c0_i32_1 = arith.constant 0 : i32
    return %c0_i32, %c0_i32_0 : i32, i32
  }
  func.func @transform_2(%arg0: i32) -> (i32, i32) {
    %c0_i32 = arith.constant 0 : i32
    %c0_i32_0 = arith.constant 0 : i32
    %c0_i32_1 = arith.constant 0 : i32
    return %c0_i32, %c0_i32_0 : i32, i32
  }
  func.func @transform_3(%arg0: i32) -> (i32, i32) {
    %c0_i32 = arith.constant 0 : i32
    %c0_i32_0 = arith.constant 0 : i32
    %c0_i32_1 = arith.constant 0 : i32
    return %c0_i32, %c0_i32_0 : i32, i32
  }
  func.func @transform_4(%arg0: i32) -> (i32, i32) {
    %c0_i32 = arith.constant 0 : i32
    %c0_i32_0 = arith.constant 0 : i32
    %c0_i32_1 = arith.constant 0 : i32
    return %c0_i32, %c0_i32_0 : i32, i32
  }
  func.func @transform_5(%arg0: i32) -> (i32, i32) {
    %c0_i32 = arith.constant 0 : i32
    %c0_i32_0 = arith.constant 0 : i32
    %c0_i32_1 = arith.constant 0 : i32
    return %c0_i32, %c0_i32_0 : i32, i32
  }
  func.func @transform_6(%arg0: i32) -> (i32, i32) {
    %c0_i32 = arith.constant 0 : i32
    %c0_i32_0 = arith.constant 0 : i32
    %c0_i32_1 = arith.constant 0 : i32
    return %c0_i32, %c0_i32_0 : i32, i32
  }
  func.func @transform_7(%arg0: i32) -> (i32, i32) {
    %c0_i32 = arith.constant 0 : i32
    %c0_i32_0 = arith.constant 0 : i32
    return %arg0, %c0_i32 : i32, i32
  }
}

</mosaic_0001>

<bundles_post_ra>
// kernel: tpu_custom_call.1
= control target key start
LH: loop header
LB: loop body
LE: loop exit
PB: predicated region body
PF: predicated region fallthrough
CT: control target
= control target key end

     0   :  { %12 = vsyncpa [#allocation3], 0  ;;  %s626_s0 = inlined_call_operand.hbm [shape: f32[8,16], index: 0, kind: input, shape index: {}]   ;;  %s627_s1 = inlined_call_operand.hbm [shape: bf16[16,128], index: 1, kind: input, shape index: {}]   ;;  %s628_s2 = inlined_call_operand.vmem [shape: f32[1,128], index: 2, kind: input, shape index: {}]   ;;  %s629_s3 = inlined_call_operand.hbm [shape: bf16[128,128], index: 3, kind: input, shape index: {}]   ;;  %s630_s4 = inlined_call_operand.vmem [shape: f32[1,128], index: 4, kind: input, shape index: {}]   ;;  %s631_s5 = inlined_call_operand.hbm [shape: bf16[128,128], index: 5, kind: input, shape index: {}]   ;;  %s632_s6 = inlined_call_operand.vmem [shape: f32[1,128], index: 6, kind: input, shape index: {}]   ;;  %s633_s7 = inlined_call_operand.hbm [shape: bf16[8,128], index: 7, kind: output, shape index: {}]  }
   0x1   :  { %13 = vsyncpa [#allocation6], 0 }
   0x2   :  { %14 = vsyncpa [#allocation9], 0  ;;  %s31_s26 = sshll.u32 %s627_s1, 4  ;;  %s32_s26 = int_to_ptr.hbm [resolvable:$true] %s31_s26 }
   0x3   :  { %15 = vsyncpa [#allocation4], 0  ;;  %s555_s27 = smov [#allocation5]   ;;  %s21_s8 = sshll.u32 %s626_s0, 4  ;;  %s22_s8 = int_to_ptr.hbm [resolvable:$true] %s21_s8 }
   0x4   :  { %s33_s28 = sshll.u32 %s555_s27, 4  ;;  %s556_s9 = smov 64   ;;  %s34_s28 = int_to_ptr.vmem [resolvable:$true] %s33_s28 }
   0x5   :  { %s557_s10 = smov 4   ;;  %s558_s11 = smov [#allocation2]  }
   0x6   :  { %39 = dma.hbm_to_vmem [thread:$0]  %s32_s26, 128, %s34_s28, [#allocation6], %s556_s9, %s556_s9, %s557_s10  }
   0x7   :  { %s23_s12 = sshll.u32 %s558_s11, 4  ;;  %s46_s15 = sshll.u32 %s629_s3, 4  ;;  %s24_s12 = int_to_ptr.vmem [resolvable:$true] %s23_s12  ;;  %s47_s15 = int_to_ptr.hbm [resolvable:$true] %s46_s15 }
   0x8   :  { %26 = dma.hbm_to_vmem [thread:$0]  %s22_s8, 128, %s24_s12, [#allocation3]  }
   0x9   :  { %s61_s17 = sshll.u32 %s631_s5, 4  ;;  %s559_s18 = smov [#allocation7]   ;;  %s62_s17 = int_to_ptr.hbm [resolvable:$true] %s61_s17 }
   0xa   :  { %s48_s19 = sshll.u32 %s559_s18, 4  ;;  %s560_s0 = smov [#allocation8]   ;;  %s49_s19 = int_to_ptr.vmem [resolvable:$true] %s48_s19 }
   0xb   :  { %54 = dma.hbm_to_vmem [thread:$0]  %s47_s15, 1024, %s49_s19, [#allocation6], %s556_s9, %s556_s9, %s557_s10  }
   0xc   :  { %s63_s20 = sshll.u32 %s560_s0, 4  ;;  %s64_s20 = int_to_ptr.vmem [resolvable:$true] %s63_s20 }
   0xd   :  { %69 = dma.hbm_to_vmem [thread:$0]  %s62_s17, 1024, %s64_s20, [#allocation9], %s556_s9, %s556_s9, %s557_s10  }
   0xe   :  { %547 = dma.done.wait [#allocation3], 128  }
   0xf   :  { %548 = vsyncadd [#allocation3], 4294967168 }
  0x10   :  { %549 = dma.done.wait [#allocation6], 1152  }
  0x11   :  { %550 = vsyncadd [#allocation6], 4294966144 }
  0x12   :  { %551 = dma.done.wait [#allocation9], 1024  }
  0x13   :  { %552 = vsyncadd [#allocation9], 4294966272  ;;  %v396_v0 = vld [vmem:[#allocation5] sm:$0xff]  ;;  %v89_v1 = vld [vmem:[#allocation2] sm:$0xff]  ;;  %vm103_vm0 = vcmask 130048   ;;  %s314_s26 = sshll.u32 %s633_s7, 4  ;;  %s315_s26 = int_to_ptr.hbm [resolvable:$true] %s314_s26 }
  0x14   :  { %v404_v2 = vld [vmem:[#allocation7 + $0x38] sm:$0xff]  ;;  %v90_v3 = vpack.c.bf16 %v89_v1, %v89_v1  ;;  %114 = vmatpush.bf16.msra.mxu0 %v396_v0  ;;  %v403_v4 = vld [vmem:[#allocation7 + $0x30] sm:$0xff]  ;;  %v402_v5 = vld [vmem:[#allocation7 + $0x28] sm:$0xff] }
  0x15   :  { %190 = vmatpush.bf16.msra.mxu1 %v404_v2  ;;  %v401_v6 = vld [vmem:[#allocation7 + $0x20] sm:$0xff]  ;;  %v400_v7 = vld [vmem:[#allocation7 + $0x18] sm:$0xff]  ;;  %v399_v8 = vld [vmem:[#allocation7 + $0x10] sm:$0xff] }
  0x16   :  { %v398_v9 = vld [vmem:[#allocation7 + $0x8] sm:$0xff]  ;;  %v397_v10 = vld [vmem:[#allocation7] sm:$0xff]  ;;  %v412_v11 = vld [vmem:[#allocation8 + $0x38] sm:$0xff] }
  0x17   :  { %330 = vmatmul.msk.bf16.vlgmr.msra.gmra.mxu0 %vm103_vm0, %v90_v3  ;;  %273 = vmatpush.bf16.msra.mxu2 %v412_v11  ;;  %v411_v12 = vld [vmem:[#allocation8 + $0x30] sm:$0xff]  ;;  %v410_v13 = vld [vmem:[#allocation8 + $0x28] sm:$0xff]  ;;  %v409_v14 = vld [vmem:[#allocation8 + $0x20] sm:$0xff] }
  0x18   :  { %v408_v15 = vld [vmem:[#allocation8 + $0x18] sm:$0xff]  ;;  %v407_v16 = vld [vmem:[#allocation8 + $0x10] sm:$0xff]  ;;  %v406_v23 = vld [vmem:[#allocation8 + $0x8] sm:$0xff] }
  0x19   :  { %191 = vmatpush.bf16.msra.mxu1 %v403_v4  ;;  %v420_v17 = vld [vmem:[%s628_s2] ss:$0 sm:$0xff]  ;;  %v405_v24 = vld [vmem:[#allocation8] sm:$0xff] }
  0x1a   :  { %v421_v25 = vld [vmem:[%s630_s4] ss:$0 sm:$0xff]  ;;  %s561_s4 = smov [#allocation10]  }
  0x1b   :  { %274 = vmatpush.bf16.msra.mxu2 %v411_v12  ;;  %v422_v31 = vld [vmem:[%s632_s6] ss:$0 sm:$0xff]  ;;  %s312_s6 = sshll.u32 %s561_s4, 4  ;;  %s313_s6 = int_to_ptr.vmem [resolvable:$true] %s312_s6 }
  0x1d   :  { %192 = vmatpush.bf16.msra.mxu1 %v402_v5 }
  0x1f   :  { %275 = vmatpush.bf16.msra.mxu2 %v410_v13 }
  0x21   :  { %193 = vmatpush.bf16.msra.mxu1 %v401_v6 }
  0x23   :  { %276 = vmatpush.bf16.msra.mxu2 %v409_v14 }
  0x25   :  { %194 = vmatpush.bf16.msra.mxu1 %v400_v7 }
  0x27   :  { %277 = vmatpush.bf16.msra.mxu2 %v408_v15 }
  0x29   :  { %195 = vmatpush.bf16.msra.mxu1 %v399_v8 }
  0x2b   :  { %278 = vmatpush.bf16.msra.mxu2 %v407_v16 }
  0x2d   :  { %196 = vmatpush.bf16.msra.mxu1 %v398_v9 }
  0x2f   :  { %279 = vmatpush.bf16.msra.mxu2 %v406_v23 }
  0x31   :  { %197 = vmatpush.bf16.msra.mxu1 %v397_v10 }
  0x33   :  { %280 = vmatpush.bf16.msra.mxu2 %v405_v24 }
  0x94   :  { %v116_v18 = vpop.f32.mrf.mxu0 }
  0x95   :  { %v117_v19 = vadd.f32 %v420_v17, %v116_v18 }
  0x97   :  { %v120_v20 = vmax.f32 %v117_v19, 0.0 }
  0x99   :  { %v121_v21 = vpack.c.bf16 %v120_v20, %v120_v20 }
  0x9b   :  { %198 = vmatmul.bf16.vlgmr.msra.gmra.mxu1 %v121_v21 }
  0x9c   :  { %v118_v22 = vpop.f32.mrf.mxu0 }
 0x118   :  { %v199_v26 = vpop.f32.mrf.mxu1 }
 0x119   :  { %v200_v27 = vadd.f32 %v421_v25, %v199_v26 }
 0x11b   :  { %v203_v28 = vmax.f32 %v200_v27, 0.0 }
 0x11d   :  { %v204_v29 = vpack.c.bf16 %v203_v28, %v203_v28 }
 0x11f   :  { %281 = vmatmul.bf16.vlgmr.msra.gmra.mxu2 %v204_v29 }
 0x120   :  { %v201_v30 = vpop.f32.mrf.mxu1 }
 0x1a2   :  { %v282_v32 = vpop.f32.mrf.mxu2 }
 0x1a3   :  { %v283_v33 = vadd.f32 %v422_v31, %v282_v32 }
 0x1a5   :  { %v395_v34 = vmul.f32 -1.442695, %v283_v33 }
 0x1a7   :  { %423 = vpow2.f32 %v395_v34 }
 0x1aa   :  { %v284_v35 = vpop.f32.mrf.mxu2 }
 0x1ad   :  { %v424_v36 = vpop.eup %423 }
 0x1ae   :  { %v289_v37 = vadd.f32 1.0, %v424_v36 }
 0x1b0   :  { %425 = vrcp.f32 %v289_v37  ;;  %v301_v41 = vand.u32 2147483648, %v289_v37  ;;  %v299_v43 = vand.u32 2147483647, %v289_v37  ;;  %vm295_vm2 = vweird.f32 %v289_v37 }
 0x1b2   :  { %v302_v45 = vor.u32 1.1754944e-38, %v301_v41  ;;  %vm300_vm4 = vcmp.eq.f32.partialorder %v299_v43, 8.507059e+37 }
 0x1b6   :  { %v426_v38 = vpop.eup %425 }
 0x1b7   :  { %v291_v39 = vmul.f32 %v426_v38, %v289_v37  ;;  %vm296_vm1 = vweird.f32 %v426_v38 }
 0x1b8   :  { %vm297_vm3 = vmor %vm295_vm2, %vm296_vm1 }
 0x1b9   :  { %v292_v40 = vsub.f32 1.0, %v291_v39 }
 0x1bb   :  { %v293_v42 = vmul.f32 %v426_v38, %v292_v40 }
 0x1bd   :  { %v294_v44 = vadd.f32 %v426_v38, %v293_v42 }
 0x1bf   :  { %v298_v46 = vsel %vm297_vm3, %v426_v38, %v294_v44 }
 0x1c0   :  { %v303_v47 = vsel %vm300_vm4, %v302_v45, %v298_v46 }
 0x1c1   :  { %v305_v48 = vpack.c.bf16 %v303_v47, %v303_v47 }
 0x1c3   :  { %306 = vst [vmem:[#allocation10] sm:$0xf] %v305_v48 }
 0x1c4   :  { %317 = dma.vmem_to_hbm [thread:$0]  %s313_s6, 64, %s315_s26, [#allocation4]  }
 0x1c5   :  { %553 = dma.done.wait [#allocation4], 64  }
 0x1c6   :  { %554 = vsyncadd [#allocation4], 4294967232 }
 0x1c7   :  { %322 = vsyncpa [#allocation3], 1 }
 0x1c8   :  { %323 = vsyncpa [#allocation6], 1 }
 0x1c9   :  { %324 = vsyncpa [#allocation9], 1 }
 0x1ca   :  { %325 = vsyncpa [#allocation4], 1 }

</bundles_post_ra>
